<compile_context>
chip_gen: v5e
topology: v5e:2x2
jax: 0.10.0
libtpu: 0.0.40
codegen_flags: <defaults>
</compile_context>

<pallas_src>
import functools

import jax
import jax.numpy as jnp
from jax.experimental import pallas as pl
from jax.experimental.pallas import tpu as pltpu


def _round_up(x, m):
    return (x + m - 1) // m * m


def _if_encoder_kernel(x_ref, out_ref, *, step_num, max_rate, threshold,
                       reset_mode, row_chunk):
    """Integrate-and-fire rate encoder (forward_1).

    x_ref:   (R_TILE, M_pad) input tile in VMEM.
    out_ref: (step_num, R_TILE, M_pad) spike tile in VMEM (time-major).
    """
    r_tile = x_ref.shape[0]
    n_chunks = r_tile // row_chunk  # static

    def process(r0):
        # drive and v live in vregs across the unrolled time loop.
        drive = x_ref[pl.ds(r0, row_chunk), :].astype(jnp.float32) * max_rate
        v = jnp.zeros_like(drive)
        for t in range(step_num):  # step_num is small & static -> unrolled
            v = v + drive
            spike = (v >= threshold).astype(jnp.float32)
            if reset_mode == "soft":
                v = v - spike * threshold
            else:  # hard reset: v[v >= threshold] = 0
                v = v * (1.0 - spike)
            out_ref[t, pl.ds(r0, row_chunk), :] = spike.astype(out_ref.dtype)

    if n_chunks == 1:
        process(0)
    else:
        @pl.loop(0, n_chunks)
        def _(ci):
            process(pl.multiple_of(ci * row_chunk, row_chunk))


def if_encoder_forward(x, *, step_num, max_rate=1.0, threshold=1.0,
                       reset_mode="soft", out_dtype=None, time_major=False,
                       vmem_budget_bytes=16 * 1024 * 1024):
    """x: [b, c, h, w] in [0, 1].

    Returns [b, c, h, w, step_num] (PyTorch-compatible), or
    [step_num, b, c, h, w] if time_major=True (avoids the extra HBM transpose).
    out_dtype can be set to e.g. jnp.bfloat16 / jnp.int8 (0/1 spikes are exact)
    to cut HBM writeback; default mirrors x.dtype for exact API parity.
    """
    b, c, h, w = x.shape
    in_dtype = jnp.dtype(x.dtype)
    out_dtype = jnp.dtype(in_dtype if out_dtype is None else out_dtype)

    R = b * c
    M = h * w
    # Lane-dense last dim: pad M up to a multiple of 128.
    M_pad = _round_up(M, 128)

    # Row chunk sized so drive + v (2 x row_chunk x M_pad f32) fit comfortably
    # in the 64 vregs (multiple of 8 sublanes, capped at 64 rows).
    row_chunk = max(8, min(64, (12288 // M_pad) // 8 * 8))

    R_pad8 = _round_up(R, 8)
    in_itemsize = in_dtype.itemsize
    out_itemsize = out_dtype.itemsize
    # Double-buffered input tile + double-buffered (step_num x larger) output tile.
    bytes_per_row = 2 * M_pad * in_itemsize + 2 * step_num * M_pad * out_itemsize

    if R_pad8 <= row_chunk:
        row_chunk = R_pad8
        r_tile = R_pad8
    else:
        budget_rows = max(row_chunk, vmem_budget_bytes // bytes_per_row)
        r_tile = (budget_rows // row_chunk) * row_chunk
        r_tile = min(r_tile, _round_up(R_pad8, row_chunk))
        r_tile = max(r_tile, row_chunk)
    R_final = _round_up(R, r_tile)

    x2 = x.reshape(R, M)
    if (R_final != R) or (M_pad != M):
        x2 = jnp.pad(x2, ((0, R_final - R), (0, M_pad - M)))

    in_block_bytes = r_tile * M_pad * in_itemsize
    out_block_bytes = step_num * r_tile * M_pad * out_itemsize
    vmem_limit = max(32 * 1024 * 1024,
                     2 * (in_block_bytes + out_block_bytes) + (4 << 20))

    kernel = functools.partial(
        _if_encoder_kernel,
        step_num=step_num,
        max_rate=float(max_rate),
        threshold=float(threshold),
        reset_mode=reset_mode,
        row_chunk=row_chunk,
    )

    grid = (R_final // r_tile,)
    out_tm = pl.pallas_call(
        kernel,
        out_shape=jax.ShapeDtypeStruct((step_num, R_final, M_pad), out_dtype),
        grid=grid,
        in_specs=[pl.BlockSpec((r_tile, M_pad), lambda i: (i, 0))],
        out_specs=pl.BlockSpec((step_num, r_tile, M_pad), lambda i: (0, i, 0)),
        compiler_params=pltpu.CompilerParams(
            dimension_semantics=("parallel",),  # row tiles are independent
            vmem_limit_bytes=int(vmem_limit),
        ),
    )(x2)

    out_tm = out_tm[:, :R, :M].reshape(step_num, b, c, h, w)
    if time_major:
        return out_tm
    # PyTorch-compatible layout [b, c, h, w, step_num].
    return jnp.transpose(out_tm, (1, 2, 3, 4, 0))


def _reference(x, *, step_num, max_rate=1.0, threshold=1.0, reset_mode="soft"):
    """Pure-JAX reference of forward_1 for validation."""
    v = jnp.zeros_like(x)
    spikes = []
    for _ in range(step_num):
        v = v + x * max_rate
        spike = (v >= threshold).astype(x.dtype)
        if reset_mode == "soft":
            v = v - spike * threshold
        else:
            v = v * (1.0 - spike)
        spikes.append(spike)
    return jnp.stack(spikes, axis=-1)


if __name__ == "__main__":
    step_num = 8

    # Case 1: lane-dense spatial (16*16 = 256, multiple of 128).
    b, c, h, w = 2, 4, 16, 16
    x = jax.random.uniform(jax.random.PRNGKey(0), (b, c, h, w), dtype=jnp.float32)
    out = jax.block_until_ready(
        if_encoder_forward(x, step_num=step_num, max_rate=1.0, threshold=1.0))
    ref = _reference(x, step_num=step_num)
    assert out.shape == (b, c, h, w, step_num), out.shape
    assert jnp.array_equal(out, ref), "Pallas output mismatch vs reference (case 1)"

    # Case 2: non-multiple-of-128 spatial (28*28 = 784 -> padded to 896) and
    # ragged rows (b*c = 6 -> padded to 8) to exercise the padding paths.
    b2, c2, h2, w2 = 2, 3, 28, 28
    x2 = jax.random.uniform(jax.random.PRNGKey(1), (b2, c2, h2, w2),
                            dtype=jnp.float32)
    out2 = jax.block_until_ready(
        if_encoder_forward(x2, step_num=step_num, max_rate=1.0, threshold=1.0))
    ref2 = _reference(x2, step_num=step_num)
    assert out2.shape == (b2, c2, h2, w2, step_num), out2.shape
    assert jnp.array_equal(out2, ref2), "Pallas output mismatch vs reference (case 2)"

    # Time-major path (no wrapper transpose) matches as well.
    out_tm = jax.block_until_ready(
        if_encoder_forward(x, step_num=step_num, time_major=True))
    assert jnp.array_equal(jnp.transpose(out_tm, (1, 2, 3, 4, 0)), ref)

    print("KERNEL_OK")
</pallas_src>

<mosaic_0001>
module attributes {stable_mosaic.version = 11 : i64} {
  func.func @_if_encoder_kernel(%arg0: i32, %arg1: memref<8x256xf32, #tpu.memory_space<vmem>>, %arg2: memref<8x8x256xf32, #tpu.memory_space<vmem>>) attributes {dimension_semantics = [#tpu.dimension_semantics<parallel>], iteration_bounds = array<i64: 1>, scalar_prefetch = 0 : i64, scratch_operands = 0 : i64, tpu.core_type = #tpu.core_type<tc>, window_params = [{transform_indices = @transform_0, window_bounds = array<i64: 8, 256>}, {transform_indices = @transform_1, window_bounds = array<i64: 8, 8, 256>}]} {
    %c0 = arith.constant 0 : index
    %c0_0 = arith.constant 0 : index
    %0 = vector.load %arg1[%c0, %c0_0] : memref<8x256xf32, #tpu.memory_space<vmem>>, vector<8x256xf32>
    %cst = arith.constant 1.000000e+00 : f32
    %1 = vector.broadcast %cst : f32 to vector<8x256xf32>
    %2 = arith.mulf %0, %1 : vector<8x256xf32>
    %cst_1 = arith.constant 0.000000e+00 : f32
    %3 = vector.broadcast %cst_1 : f32 to vector<8x256xf32>
    %4 = arith.addf %3, %2 : vector<8x256xf32>
    %cst_2 = arith.constant 1.000000e+00 : f32
    %5 = vector.broadcast %cst_2 : f32 to vector<8x256xf32>
    %6 = arith.cmpf oge, %4, %5 : vector<8x256xf32>
    %7 = arith.extui %6 : vector<8x256xi1> to vector<8x256xi32>
    %8 = arith.sitofp %7 : vector<8x256xi32> to vector<8x256xf32>
    %cst_3 = arith.constant 1.000000e+00 : f32
    %9 = vector.broadcast %cst_3 : f32 to vector<8x256xf32>
    %10 = arith.mulf %8, %9 : vector<8x256xf32>
    %11 = arith.subf %4, %10 : vector<8x256xf32>
    %c0_4 = arith.constant 0 : index
    %c0_5 = arith.constant 0 : index
    %c0_6 = arith.constant 0 : index
    %12 = vector.load %arg2[%c0_4, %c0_5, %c0_6] : memref<8x8x256xf32, #tpu.memory_space<vmem>>, vector<1x8x256xf32>
    %13 = vector.shape_cast %12 : vector<1x8x256xf32> to vector<8x256xf32>
    %14 = vector.shape_cast %8 : vector<8x256xf32> to vector<1x8x256xf32>
    tpu.vector_store %arg2[%c0_4, %c0_5, %c0_6], %14 {strides = array<i32>} : memref<8x8x256xf32, #tpu.memory_space<vmem>>, vector<1x8x256xf32>,
    %15 = arith.addf %11, %2 : vector<8x256xf32>
    %cst_7 = arith.constant 1.000000e+00 : f32
    %16 = vector.broadcast %cst_7 : f32 to vector<8x256xf32>
    %17 = arith.cmpf oge, %15, %16 : vector<8x256xf32>
    %18 = arith.extui %17 : vector<8x256xi1> to vector<8x256xi32>
    %19 = arith.sitofp %18 : vector<8x256xi32> to vector<8x256xf32>
    %cst_8 = arith.constant 1.000000e+00 : f32
    %20 = vector.broadcast %cst_8 : f32 to vector<8x256xf32>
    %21 = arith.mulf %19, %20 : vector<8x256xf32>
    %22 = arith.subf %15, %21 : vector<8x256xf32>
    %c1 = arith.constant 1 : index
    %c0_9 = arith.constant 0 : index
    %c0_10 = arith.constant 0 : index
    %23 = vector.load %arg2[%c1, %c0_9, %c0_10] : memref<8x8x256xf32, #tpu.memory_space<vmem>>, vector<1x8x256xf32>
    %24 = vector.shape_cast %23 : vector<1x8x256xf32> to vector<8x256xf32>
    %25 = vector.shape_cast %19 : vector<8x256xf32> to vector<1x8x256xf32>
    tpu.vector_store %arg2[%c1, %c0_9, %c0_10], %25 {strides = array<i32>} : memref<8x8x256xf32, #tpu.memory_space<vmem>>, vector<1x8x256xf32>,
    %26 = arith.addf %22, %2 : vector<8x256xf32>
    %cst_11 = arith.constant 1.000000e+00 : f32
    %27 = vector.broadcast %cst_11 : f32 to vector<8x256xf32>
    %28 = arith.cmpf oge, %26, %27 : vector<8x256xf32>
    %29 = arith.extui %28 : vector<8x256xi1> to vector<8x256xi32>
    %30 = arith.sitofp %29 : vector<8x256xi32> to vector<8x256xf32>
    %cst_12 = arith.constant 1.000000e+00 : f32
    %31 = vector.broadcast %cst_12 : f32 to vector<8x256xf32>
    %32 = arith.mulf %30, %31 : vector<8x256xf32>
    %33 = arith.subf %26, %32 : vector<8x256xf32>
    %c2 = arith.constant 2 : index
    %c0_13 = arith.constant 0 : index
    %c0_14 = arith.constant 0 : index
    %34 = vector.load %arg2[%c2, %c0_13, %c0_14] : memref<8x8x256xf32, #tpu.memory_space<vmem>>, vector<1x8x256xf32>
    %35 = vector.shape_cast %34 : vector<1x8x256xf32> to vector<8x256xf32>
    %36 = vector.shape_cast %30 : vector<8x256xf32> to vector<1x8x256xf32>
    tpu.vector_store %arg2[%c2, %c0_13, %c0_14], %36 {strides = array<i32>} : memref<8x8x256xf32, #tpu.memory_space<vmem>>, vector<1x8x256xf32>,
    %37 = arith.addf %33, %2 : vector<8x256xf32>
    %cst_15 = arith.constant 1.000000e+00 : f32
    %38 = vector.broadcast %cst_15 : f32 to vector<8x256xf32>
    %39 = arith.cmpf oge, %37, %38 : vector<8x256xf32>
    %40 = arith.extui %39 : vector<8x256xi1> to vector<8x256xi32>
    %41 = arith.sitofp %40 : vector<8x256xi32> to vector<8x256xf32>
    %cst_16 = arith.constant 1.000000e+00 : f32
    %42 = vector.broadcast %cst_16 : f32 to vector<8x256xf32>
    %43 = arith.mulf %41, %42 : vector<8x256xf32>
    %44 = arith.subf %37, %43 : vector<8x256xf32>
    %c3 = arith.constant 3 : index
    %c0_17 = arith.constant 0 : index
    %c0_18 = arith.constant 0 : index
    %45 = vector.load %arg2[%c3, %c0_17, %c0_18] : memref<8x8x256xf32, #tpu.memory_space<vmem>>, vector<1x8x256xf32>
    %46 = vector.shape_cast %45 : vector<1x8x256xf32> to vector<8x256xf32>
    %47 = vector.shape_cast %41 : vector<8x256xf32> to vector<1x8x256xf32>
    tpu.vector_store %arg2[%c3, %c0_17, %c0_18], %47 {strides = array<i32>} : memref<8x8x256xf32, #tpu.memory_space<vmem>>, vector<1x8x256xf32>,
    %48 = arith.addf %44, %2 : vector<8x256xf32>
    %cst_19 = arith.constant 1.000000e+00 : f32
    %49 = vector.broadcast %cst_19 : f32 to vector<8x256xf32>
    %50 = arith.cmpf oge, %48, %49 : vector<8x256xf32>
    %51 = arith.extui %50 : vector<8x256xi1> to vector<8x256xi32>
    %52 = arith.sitofp %51 : vector<8x256xi32> to vector<8x256xf32>
    %cst_20 = arith.constant 1.000000e+00 : f32
    %53 = vector.broadcast %cst_20 : f32 to vector<8x256xf32>
    %54 = arith.mulf %52, %53 : vector<8x256xf32>
    %55 = arith.subf %48, %54 : vector<8x256xf32>
    %c4 = arith.constant 4 : index
    %c0_21 = arith.constant 0 : index
    %c0_22 = arith.constant 0 : index
    %56 = vector.load %arg2[%c4, %c0_21, %c0_22] : memref<8x8x256xf32, #tpu.memory_space<vmem>>, vector<1x8x256xf32>
    %57 = vector.shape_cast %56 : vector<1x8x256xf32> to vector<8x256xf32>
    %58 = vector.shape_cast %52 : vector<8x256xf32> to vector<1x8x256xf32>
    tpu.vector_store %arg2[%c4, %c0_21, %c0_22], %58 {strides = array<i32>} : memref<8x8x256xf32, #tpu.memory_space<vmem>>, vector<1x8x256xf32>,
    %59 = arith.addf %55, %2 : vector<8x256xf32>
    %cst_23 = arith.constant 1.000000e+00 : f32
    %60 = vector.broadcast %cst_23 : f32 to vector<8x256xf32>
    %61 = arith.cmpf oge, %59, %60 : vector<8x256xf32>
    %62 = arith.extui %61 : vector<8x256xi1> to vector<8x256xi32>
    %63 = arith.sitofp %62 : vector<8x256xi32> to vector<8x256xf32>
    %cst_24 = arith.constant 1.000000e+00 : f32
    %64 = vector.broadcast %cst_24 : f32 to vector<8x256xf32>
    %65 = arith.mulf %63, %64 : vector<8x256xf32>
    %66 = arith.subf %59, %65 : vector<8x256xf32>
    %c5 = arith.constant 5 : index
    %c0_25 = arith.constant 0 : index
    %c0_26 = arith.constant 0 : index
    %67 = vector.load %arg2[%c5, %c0_25, %c0_26] : memref<8x8x256xf32, #tpu.memory_space<vmem>>, vector<1x8x256xf32>
    %68 = vector.shape_cast %67 : vector<1x8x256xf32> to vector<8x256xf32>
    %69 = vector.shape_cast %63 : vector<8x256xf32> to vector<1x8x256xf32>
    tpu.vector_store %arg2[%c5, %c0_25, %c0_26], %69 {strides = array<i32>} : memref<8x8x256xf32, #tpu.memory_space<vmem>>, vector<1x8x256xf32>,
    %70 = arith.addf %66, %2 : vector<8x256xf32>
    %cst_27 = arith.constant 1.000000e+00 : f32
    %71 = vector.broadcast %cst_27 : f32 to vector<8x256xf32>
    %72 = arith.cmpf oge, %70, %71 : vector<8x256xf32>
    %73 = arith.extui %72 : vector<8x256xi1> to vector<8x256xi32>
    %74 = arith.sitofp %73 : vector<8x256xi32> to vector<8x256xf32>
    %cst_28 = arith.constant 1.000000e+00 : f32
    %75 = vector.broadcast %cst_28 : f32 to vector<8x256xf32>
    %76 = arith.mulf %74, %75 : vector<8x256xf32>
    %77 = arith.subf %70, %76 : vector<8x256xf32>
    %c6 = arith.constant 6 : index
    %c0_29 = arith.constant 0 : index
    %c0_30 = arith.constant 0 : index
    %78 = vector.load %arg2[%c6, %c0_29, %c0_30] : memref<8x8x256xf32, #tpu.memory_space<vmem>>, vector<1x8x256xf32>
    %79 = vector.shape_cast %78 : vector<1x8x256xf32> to vector<8x256xf32>
    %80 = vector.shape_cast %74 : vector<8x256xf32> to vector<1x8x256xf32>
    tpu.vector_store %arg2[%c6, %c0_29, %c0_30], %80 {strides = array<i32>} : memref<8x8x256xf32, #tpu.memory_space<vmem>>, vector<1x8x256xf32>,
    %81 = arith.addf %77, %2 : vector<8x256xf32>
    %cst_31 = arith.constant 1.000000e+00 : f32
    %82 = vector.broadcast %cst_31 : f32 to vector<8x256xf32>
    %83 = arith.cmpf oge, %81, %82 : vector<8x256xf32>
    %84 = arith.extui %83 : vector<8x256xi1> to vector<8x256xi32>
    %85 = arith.sitofp %84 : vector<8x256xi32> to vector<8x256xf32>
    %c7 = arith.constant 7 : index
    %c0_32 = arith.constant 0 : index
    %c0_33 = arith.constant 0 : index
    %86 = vector.load %arg2[%c7, %c0_32, %c0_33] : memref<8x8x256xf32, #tpu.memory_space<vmem>>, vector<1x8x256xf32>
    %87 = vector.shape_cast %86 : vector<1x8x256xf32> to vector<8x256xf32>
    %88 = vector.shape_cast %85 : vector<8x256xf32> to vector<1x8x256xf32>
    tpu.vector_store %arg2[%c7, %c0_32, %c0_33], %88 {strides = array<i32>} : memref<8x8x256xf32, #tpu.memory_space<vmem>>, vector<1x8x256xf32>,
    return
  }
  func.func @transform_0(%arg0: i32) -> (i32, i32) {
    %c0_i32 = arith.constant 0 : i32
    %c0_i32_0 = arith.constant 0 : i32
    return %arg0, %c0_i32 : i32, i32
  }
  func.func @transform_1(%arg0: i32) -> (i32, i32, i32) {
    %c0_i32 = arith.constant 0 : i32
    %c0_i32_0 = arith.constant 0 : i32
    %c0_i32_1 = arith.constant 0 : i32
    return %c0_i32, %arg0, %c0_i32_0 : i32, i32, i32
  }
}

</mosaic_0001>

<bundles_post_ra>
// kernel: tpu_custom_call.1
= control target key start
LH: loop header
LB: loop body
LE: loop exit
PB: predicated region body
PF: predicated region fallthrough
CT: control target
= control target key end

     0   :  { %6 = vsyncpa [#allocation3], 0  ;;  %s277_s0 = inlined_call_operand.hbm [shape: f32[8,256], index: 0, kind: input, shape index: {}]   ;;  %s278_s1 = inlined_call_operand.hbm [shape: f32[8,8,256], index: 1, kind: output, shape index: {}]  }
   0x1   :  { %7 = vsyncpa [#allocation4], 0  ;;  %s13_s8 = sshll.u32 %s277_s0, 4  ;;  %s218_s9 = smov [#allocation2]   ;;  %s14_s8 = int_to_ptr.hbm [resolvable:$true] %s13_s8 }
   0x2   :  { %s15_s10 = sshll.u32 %s218_s9, 4  ;;  %s16_s10 = int_to_ptr.vmem [resolvable:$true] %s15_s10 }
   0x3   :  { %18 = dma.hbm_to_vmem [thread:$0]  %s14_s8, 256, %s16_s10, [#allocation3]  }
   0x4   :  { %214 = dma.done.wait [#allocation3], 256  }
   0x5   :  { %215 = vsyncadd [#allocation3], 4294967040  ;;  %v236_v0 = vld [vmem:[#allocation2] sm:$0xff]  ;;  %v238_v1 = vld [vmem:[#allocation2 + $0x8] sm:$0xff]  ;;  %v219_v2 = vmov 0.0   ;;  %s220_s0 = smov [#allocation5]  }
   0x6   :  { %vm27_vm0 = vcmp.ge.f32.partialorder %v236_v0, 1.0  ;;  %vm28_vm1 = vcmp.ge.f32.partialorder %v238_v1, 1.0  ;;  %s130_s11 = sshll.u32 %s220_s0, 4  ;;  %s132_s14 = sshll.u32 %s278_s1, 4  ;;  %s131_s11 = int_to_ptr.vmem [resolvable:$true] %s130_s11  ;;  %s133_s14 = int_to_ptr.hbm [resolvable:$true] %s132_s14 }
   0x7   :  { %v145_v3 = vsel %vm27_vm0, 1.0, %v219_v2  ;;  %v146_v4 = vsel %vm28_vm1, 1.0, %v219_v2  ;;  %s221_s15 = smov 256   ;;  %s222_s16 = smov 16  }
   0x8   :  { %v33_v5 = vsub.f32 %v236_v0, %v145_v3  ;;  %35 = vst [vmem:[#allocation5] sm:$0xff] %v145_v3  ;;  %v34_v6 = vsub.f32 %v238_v1, %v146_v4 }
   0x9   :  { %36 = vst [vmem:[#allocation5 + $0x8] sm:$0xff] %v146_v4 }
   0xa   :  { %v37_v7 = vadd.f32 %v33_v5, %v236_v0  ;;  %v38_v8 = vadd.f32 %v34_v6, %v238_v1 }
   0xc   :  { %vm39_vm2 = vcmp.ge.f32.partialorder %v37_v7, 1.0  ;;  %vm40_vm3 = vcmp.ge.f32.partialorder %v38_v8, 1.0 }
   0xd   :  { %v147_v9 = vsel %vm39_vm2, 1.0, %v219_v2  ;;  %v148_v10 = vsel %vm40_vm3, 1.0, %v219_v2 }
   0xe   :  { %v45_v11 = vsub.f32 %v37_v7, %v147_v9  ;;  %48 = vst [vmem:[#allocation5 + $0x10] sm:$0xff] %v147_v9  ;;  %v46_v12 = vsub.f32 %v38_v8, %v148_v10 }
   0xf   :  { %49 = vst [vmem:[#allocation5 + $0x18] sm:$0xff] %v148_v10 }
  0x10   :  { %v50_v13 = vadd.f32 %v45_v11, %v236_v0  ;;  %v51_v14 = vadd.f32 %v46_v12, %v238_v1 }
  0x12   :  { %vm52_vm4 = vcmp.ge.f32.partialorder %v50_v13, 1.0  ;;  %vm53_vm5 = vcmp.ge.f32.partialorder %v51_v14, 1.0 }
  0x13   :  { %v149_v15 = vsel %vm52_vm4, 1.0, %v219_v2  ;;  %v150_v16 = vsel %vm53_vm5, 1.0, %v219_v2 }
  0x14   :  { %v58_v17 = vsub.f32 %v50_v13, %v149_v15  ;;  %61 = vst [vmem:[#allocation5 + $0x20] sm:$0xff] %v149_v15  ;;  %v59_v18 = vsub.f32 %v51_v14, %v150_v16 }
  0x15   :  { %62 = vst [vmem:[#allocation5 + $0x28] sm:$0xff] %v150_v16 }
  0x16   :  { %v63_v19 = vadd.f32 %v58_v17, %v236_v0  ;;  %v64_v20 = vadd.f32 %v59_v18, %v238_v1 }
  0x18   :  { %vm65_vm6 = vcmp.ge.f32.partialorder %v63_v19, 1.0  ;;  %vm66_vm7 = vcmp.ge.f32.partialorder %v64_v20, 1.0 }
  0x19   :  { %v151_v21 = vsel %vm65_vm6, 1.0, %v219_v2  ;;  %v152_v22 = vsel %vm66_vm7, 1.0, %v219_v2 }
  0x1a   :  { %v71_v23 = vsub.f32 %v63_v19, %v151_v21  ;;  %74 = vst [vmem:[#allocation5 + $0x30] sm:$0xff] %v151_v21  ;;  %v72_v24 = vsub.f32 %v64_v20, %v152_v22 }
  0x1b   :  { %75 = vst [vmem:[#allocation5 + $0x38] sm:$0xff] %v152_v22 }
  0x1c   :  { %v76_v25 = vadd.f32 %v71_v23, %v236_v0  ;;  %v77_v26 = vadd.f32 %v72_v24, %v238_v1 }
  0x1e   :  { %vm78_vm8 = vcmp.ge.f32.partialorder %v76_v25, 1.0  ;;  %vm79_vm9 = vcmp.ge.f32.partialorder %v77_v26, 1.0 }
  0x1f   :  { %v153_v27 = vsel %vm78_vm8, 1.0, %v219_v2  ;;  %v154_v28 = vsel %vm79_vm9, 1.0, %v219_v2 }
  0x20   :  { %v84_v29 = vsub.f32 %v76_v25, %v153_v27  ;;  %87 = vst [vmem:[#allocation5 + $0x40] sm:$0xff] %v153_v27  ;;  %v85_v30 = vsub.f32 %v77_v26, %v154_v28 }
  0x21   :  { %88 = vst [vmem:[#allocation5 + $0x48] sm:$0xff] %v154_v28 }
  0x22   :  { %v89_v31 = vadd.f32 %v84_v29, %v236_v0  ;;  %v90_v32 = vadd.f32 %v85_v30, %v238_v1 }
  0x24   :  { %vm91_vm10 = vcmp.ge.f32.partialorder %v89_v31, 1.0  ;;  %vm92_vm11 = vcmp.ge.f32.partialorder %v90_v32, 1.0 }
  0x25   :  { %v155_v33 = vsel %vm91_vm10, 1.0, %v219_v2  ;;  %v156_v34 = vsel %vm92_vm11, 1.0, %v219_v2 }
  0x26   :  { %v97_v35 = vsub.f32 %v89_v31, %v155_v33  ;;  %100 = vst [vmem:[#allocation5 + $0x50] sm:$0xff] %v155_v33  ;;  %v98_v36 = vsub.f32 %v90_v32, %v156_v34 }
  0x27   :  { %101 = vst [vmem:[#allocation5 + $0x58] sm:$0xff] %v156_v34 }
  0x28   :  { %v102_v37 = vadd.f32 %v97_v35, %v236_v0  ;;  %v103_v38 = vadd.f32 %v98_v36, %v238_v1 }
  0x2a   :  { %vm104_vm12 = vcmp.ge.f32.partialorder %v102_v37, 1.0  ;;  %vm105_vm13 = vcmp.ge.f32.partialorder %v103_v38, 1.0 }
  0x2b   :  { %v157_v39 = vsel %vm104_vm12, 1.0, %v219_v2  ;;  %v158_v40 = vsel %vm105_vm13, 1.0, %v219_v2 }
  0x2c   :  { %v110_v41 = vsub.f32 %v102_v37, %v157_v39  ;;  %113 = vst [vmem:[#allocation5 + $0x60] sm:$0xff] %v157_v39  ;;  %v111_v42 = vsub.f32 %v103_v38, %v158_v40 }
  0x2d   :  { %114 = vst [vmem:[#allocation5 + $0x68] sm:$0xff] %v158_v40 }
  0x2e   :  { %v115_v43 = vadd.f32 %v110_v41, %v236_v0  ;;  %v116_v44 = vadd.f32 %v111_v42, %v238_v1 }
  0x30   :  { %vm117_vm14 = vcmp.ge.f32.partialorder %v115_v43, 1.0  ;;  %vm118_vm15 = vcmp.ge.f32.partialorder %v116_v44, 1.0 }
  0x31   :  { %v159_v45 = vsel %vm117_vm14, 1.0, %v219_v2  ;;  %v160_v46 = vsel %vm118_vm15, 1.0, %v219_v2 }
  0x32   :  { %124 = vst [vmem:[#allocation5 + $0x70] sm:$0xff] %v159_v45 }
  0x33   :  { %125 = vst [vmem:[#allocation5 + $0x78] sm:$0xff] %v160_v46 }
  0x34   :  { %138 = dma.vmem_to_hbm [thread:$0]  %s131_s11, 2048, %s133_s14, [#allocation4], %s221_s15, %s221_s15, %s222_s16  }
  0x35   :  { %216 = dma.done.wait [#allocation4], 2048  }
  0x36   :  { %217 = vsyncadd [#allocation4], 4294965248 }
  0x37   :  { %143 = vsyncpa [#allocation3], 1 }
  0x38   :  { %144 = vsyncpa [#allocation4], 1 }

</bundles_post_ra>
